<compile_context>
chip_gen: v6e
topology: v6e:2x2x1
jax: 0.10.0
libtpu: 0.0.40
codegen_flags: <defaults>
</compile_context>

<pallas_src>
import math
import jax
import jax.numpy as jnp
from jax.experimental import pallas as pl
from jax.experimental.pallas import tpu as pltpu

LANE = 128     # vreg lane width: hidden feature dims are padded to this.
SUBLANE = 8    # vreg sublane count: batch tiles are padded to this.


def _round_up(n, m):
    return ((n + m - 1) // m) * m


def _pad_to(a, shape):
    widths = [(0, t - s) for s, t in zip(a.shape, shape)]
    if all(w == (0, 0) for w in widths):
        return a
    return jnp.pad(a, widths)


def _num_tensorcores(default=1):
    """Best-effort TensorCore count of the local device (2 on v7x, else 1)."""
    try:
        d = jax.devices()[0]
        for attr in ("num_cores", "core_count"):
            n = getattr(d, attr, None)
            if isinstance(n, int) and n > 0:
                return n
    except Exception:
        pass
    return default


def _make_mlp_kernel(n_layers):
    """Kernel over one batch tile: refs = (x, W0, b0, ..., W_{L-1}, b_{L-1}, out).
    ReLU after every layer except the last; bf16 MXU inputs, f32 accumulation."""

    def kernel(*refs):
        x_ref = refs[0]
        wb_refs = refs[1:1 + 2 * n_layers]
        o_ref = refs[1 + 2 * n_layers]

        h = x_ref[...]
        for li in range(n_layers):
            w_ref, b_ref = wb_refs[2 * li], wb_refs[2 * li + 1]
            h = jnp.dot(h.astype(w_ref.dtype), w_ref[...],
                        preferred_element_type=jnp.float32) + b_ref[...]
            if li < n_layers - 1:
                h = jnp.maximum(h, 0.0)          # f32 VPU epilogue
        o_ref[...] = h.astype(o_ref.dtype)

    return kernel


def mlp_encoder_forward(obs, keys, layers, *,
                        compute_dtype=jnp.bfloat16,
                        out_dtype=jnp.float32,
                        batch_tile=2048,
                        min_pallas_batch=256,
                        num_cores=None):
    """Forward pass of MLPEncoder.

    obs:    dict of (B, d_k) float arrays.
    keys:   ordering of obs keys to concatenate.
    layers: sequence of (W, b) pairs, W shaped (in_features, out_features);
            ReLU is applied after every layer except the last.
    """
    xs = [obs[k] for k in keys]
    x = xs[0] if len(xs) == 1 else jnp.concatenate(xs, axis=-1)
    B, din = x.shape
    n_layers = len(layers)
    feat = layers[-1][0].shape[1]

    # Tiny batches: one fused XLA dot-chain beats pallas_call launch overhead.
    if B < min_pallas_batch:
        h = x
        for i, (w, b) in enumerate(layers):
            h = h @ w + b.reshape(1, -1)
            if i < n_layers - 1:
                h = jnp.maximum(h, 0.0)
        return h.astype(out_dtype)

    # ---- lane-pad *hidden* feature dims only (exact: padded weight rows/cols
    # and bias entries are zero, so padded lanes stay zero through ReLU).  The
    # final output dim stays unpadded -> minimal HBM writeback. ----
    outs = [w.shape[1] for (w, _) in layers]
    out_p = [_round_up(o, LANE) for o in outs[:-1]] + [feat]     # last unpadded
    in_p = [din] + out_p[:-1]
    w_pads, b_pads = [], []
    for (w, b), ip, op in zip(layers, in_p, out_p):
        w_pads.append(_pad_to(w, (ip, op)).astype(compute_dtype))
        b_pads.append(_pad_to(b.reshape(1, -1), (1, op)).astype(jnp.float32))

    # ---- batch tiling: minimal 8-sublane padding; grid spans all TensorCores
    # on multi-core parts (v7x) when there is enough work. ----
    if num_cores is None:
        num_cores = _num_tensorcores()
    num = pl.cdiv(B, batch_tile)
    if num_cores > 1 and B >= num_cores * SUBLANE:
        num = _round_up(max(num, num_cores), num_cores)
    bt = _round_up(pl.cdiv(B, num), SUBLANE)
    B_p = num * bt
    x_p = _pad_to(x, (B_p, din))       # native dtype; cast to bf16 in-kernel
    grid = (num,)

    # x / out tiles walk the batch axis; weights & biases stay VMEM-resident.
    x_spec = pl.BlockSpec((bt, din), lambda i: (i, 0))
    resident = lambda a: pl.BlockSpec(a.shape, lambda i: (0, 0))
    wb_specs = []
    for w, b in zip(w_pads, b_pads):
        wb_specs += [resident(w), resident(b)]
    out_spec = pl.BlockSpec((bt, feat), lambda i: (i, 0))

    # Advisory cost estimate so XLA schedules around the custom call.
    flops = 2 * B_p * sum(ip * op for ip, op in zip(in_p, out_p))
    wb_bytes = sum(w.size * w.dtype.itemsize + b.size * b.dtype.itemsize
                   for w, b in zip(w_pads, b_pads))
    bytes_accessed = (x_p.size * x_p.dtype.itemsize + wb_bytes
                      + B_p * feat * jnp.dtype(out_dtype).itemsize)
    cost = pl.CostEstimate(flops=int(flops), transcendentals=0,
                           bytes_accessed=int(bytes_accessed))

    # VMEM footprint: double-buffered x/out tiles + (default 2-deep) weights +
    # a few live (bt, max_hidden) f32 activations.  Pin the scoped limit only
    # when it approaches the 16 MiB v5e default; otherwise platform default.
    vmem_estimate = (2 * bt * din * x_p.dtype.itemsize
                     + 2 * bt * feat * jnp.dtype(out_dtype).itemsize
                     + 2 * wb_bytes
                     + 3 * bt * max(out_p) * 4)
    vmem_limit = None
    if vmem_estimate > 12 * 2**20:
        vmem_limit = min(max(2 * vmem_estimate, 16 * 2**20), 48 * 2**20)

    wb_flat = [a for pair in zip(w_pads, b_pads) for a in pair]
    out_padded = pl.pallas_call(
        _make_mlp_kernel(n_layers),
        out_shape=jax.ShapeDtypeStruct((B_p, feat), out_dtype),
        grid=grid,
        in_specs=[x_spec] + wb_specs,
        out_specs=out_spec,
        compiler_params=pltpu.CompilerParams(
            dimension_semantics=("parallel",),
            vmem_limit_bytes=vmem_limit),
        cost_estimate=cost,
    )(x_p, *wb_flat)

    return out_padded if B_p == B else out_padded[:B]


def init_linear(key, fan_in, fan_out, dtype=jnp.float32):
    # Deterministic init mimicking nn.Linear default (uniform +-1/sqrt(fan_in)).
    kw, kb = jax.random.split(key)
    bound = 1.0 / math.sqrt(fan_in)
    w = jax.random.uniform(kw, (fan_in, fan_out), dtype, -bound, bound)
    b = jax.random.uniform(kb, (fan_out,), dtype, -bound, bound)
    return w, b


def _reference(obs, keys, layers):
    x = jnp.concatenate([obs[k] for k in keys], axis=-1)
    h = x
    for i, (w, b) in enumerate(layers):
        h = h @ w + b.reshape(1, -1)
        if i < len(layers) - 1:
            h = jnp.maximum(h, 0.0)
    return h


if __name__ == "__main__":
    # MLPEncoder defaults at small shapes.
    keys = ("state", "velocity")
    key_dims = {"state": 16, "velocity": 16}
    input_dim = sum(key_dims.values())      # 32
    dense_units = 64
    features_dim = 32
    mlp_layers = 2

    rng = jax.random.PRNGKey(0)
    rng, k_obs_a, k_obs_b, kl1, kl2, kl3 = jax.random.split(rng, 6)

    layer_keys = [kl1, kl2, kl3]
    layers, fan_in = [], input_dim
    for li in range(mlp_layers):
        layers.append(init_linear(layer_keys[li], fan_in, dense_units))
        fan_in = dense_units
    layers.append(init_linear(layer_keys[-1], fan_in, features_dim))

    def run_check(batch, k_obs, **kw):
        ka, kb = jax.random.split(k_obs)
        obs = {
            "state": jax.random.normal(ka, (batch, key_dims["state"]), jnp.float32),
            "velocity": jax.random.normal(kb, (batch, key_dims["velocity"]), jnp.float32),
        }
        out = jax.block_until_ready(mlp_encoder_forward(obs, keys, layers, **kw))
        ref = _reference(obs, keys, layers)      # pure-JAX f32 reference
        assert out.shape == (batch, features_dim)
        assert bool(jnp.all(jnp.isfinite(out)))
        # bf16 MXU inputs with f32 accumulation -> relaxed tolerance.
        assert jnp.allclose(out, ref, atol=5e-2, rtol=5e-2), \
            float(jnp.max(jnp.abs(out - ref)))

    # Small batch forced through the Pallas path.
    run_check(8, k_obs_a, min_pallas_batch=1)
    # Non-multiple-of-8 batch exercising batch padding / multi-core grid split.
    run_check(300, k_obs_b)

    print("KERNEL_OK")
</pallas_src>

<mosaic_0001>
module attributes {stable_mosaic.version = 11 : i64} {
  func.func @kernel(%arg0: i32, %arg1: memref<8x32xf32, #tpu.memory_space<vmem>>, %arg2: memref<32x128xbf16, #tpu.memory_space<vmem>>, %arg3: memref<1x128xf32, #tpu.memory_space<vmem>>, %arg4: memref<128x128xbf16, #tpu.memory_space<vmem>>, %arg5: memref<1x128xf32, #tpu.memory_space<vmem>>, %arg6: memref<128x32xbf16, #tpu.memory_space<vmem>>, %arg7: memref<1x32xf32, #tpu.memory_space<vmem>>, %arg8: memref<8x32xf32, #tpu.memory_space<vmem>>) attributes {dimension_semantics = [#tpu.dimension_semantics<parallel>], iteration_bounds = array<i64: 1>, scalar_prefetch = 0 : i64, scratch_operands = 0 : i64, tpu.core_type = #tpu.core_type<tc>, window_params = [{transform_indices = @transform_0, window_bounds = array<i64: 8, 32>}, {pipeline_mode = #tpu.pipeline_mode<synchronous>, transform_indices = @transform_1, window_bounds = array<i64: 32, 128>}, {pipeline_mode = #tpu.pipeline_mode<synchronous>, transform_indices = @transform_2, window_bounds = array<i64: 1, 128>}, {pipeline_mode = #tpu.pipeline_mode<synchronous>, transform_indices = @transform_3, window_bounds = array<i64: 128, 128>}, {pipeline_mode = #tpu.pipeline_mode<synchronous>, transform_indices = @transform_4, window_bounds = array<i64: 1, 128>}, {pipeline_mode = #tpu.pipeline_mode<synchronous>, transform_indices = @transform_5, window_bounds = array<i64: 128, 32>}, {pipeline_mode = #tpu.pipeline_mode<synchronous>, transform_indices = @transform_6, window_bounds = array<i64: 1, 32>}, {transform_indices = @transform_7, window_bounds = array<i64: 8, 32>}]} {
    %c0 = arith.constant 0 : index
    %c0_0 = arith.constant 0 : index
    %0 = vector.load %arg1[%c0, %c0_0] : memref<8x32xf32, #tpu.memory_space<vmem>>, vector<8x32xf32>
    %1 = arith.truncf %0 : vector<8x32xf32> to vector<8x32xbf16>
    %c0_1 = arith.constant 0 : index
    %c0_2 = arith.constant 0 : index
    %2 = vector.load %arg2[%c0_1, %c0_2] : memref<32x128xbf16, #tpu.memory_space<vmem>>, vector<32x128xbf16>
    %cst = arith.constant dense<0.000000e+00> : vector<8x128xf32>
    %3 = tpu.matmul %1, %2, %cst {dimension_numbers = #tpu.dot_dimension_numbers<[1], [0], [0], [1], [0, 0, 1, 1], [], []>} : vector<8x32xbf16>, vector<32x128xbf16>, vector<8x128xf32> -> vector<8x128xf32>
    %c0_3 = arith.constant 0 : index
    %c0_4 = arith.constant 0 : index
    %4 = vector.load %arg3[%c0_3, %c0_4] : memref<1x128xf32, #tpu.memory_space<vmem>>, vector<1x128xf32>
    %5 = vector.broadcast %4 : vector<1x128xf32> to vector<8x128xf32>
    %6 = arith.addf %3, %5 : vector<8x128xf32>
    %cst_5 = arith.constant 0.000000e+00 : f32
    %7 = vector.broadcast %cst_5 : f32 to vector<8x128xf32>
    %8 = arith.maximumf %6, %7 : vector<8x128xf32>
    %9 = arith.truncf %8 : vector<8x128xf32> to vector<8x128xbf16>
    %c0_6 = arith.constant 0 : index
    %c0_7 = arith.constant 0 : index
    %10 = vector.load %arg4[%c0_6, %c0_7] : memref<128x128xbf16, #tpu.memory_space<vmem>>, vector<128x128xbf16>
    %cst_8 = arith.constant dense<0.000000e+00> : vector<8x128xf32>
    %11 = tpu.matmul %9, %10, %cst_8 {dimension_numbers = #tpu.dot_dimension_numbers<[1], [0], [0], [1], [0, 0, 1, 1], [], []>} : vector<8x128xbf16>, vector<128x128xbf16>, vector<8x128xf32> -> vector<8x128xf32>
    %c0_9 = arith.constant 0 : index
    %c0_10 = arith.constant 0 : index
    %12 = vector.load %arg5[%c0_9, %c0_10] : memref<1x128xf32, #tpu.memory_space<vmem>>, vector<1x128xf32>
    %13 = vector.broadcast %12 : vector<1x128xf32> to vector<8x128xf32>
    %14 = arith.addf %11, %13 : vector<8x128xf32>
    %cst_11 = arith.constant 0.000000e+00 : f32
    %15 = vector.broadcast %cst_11 : f32 to vector<8x128xf32>
    %16 = arith.maximumf %14, %15 : vector<8x128xf32>
    %17 = arith.truncf %16 : vector<8x128xf32> to vector<8x128xbf16>
    %c0_12 = arith.constant 0 : index
    %c0_13 = arith.constant 0 : index
    %18 = vector.load %arg6[%c0_12, %c0_13] : memref<128x32xbf16, #tpu.memory_space<vmem>>, vector<128x32xbf16>
    %cst_14 = arith.constant dense<0.000000e+00> : vector<8x32xf32>
    %19 = tpu.matmul %17, %18, %cst_14 {dimension_numbers = #tpu.dot_dimension_numbers<[1], [0], [0], [1], [0, 0, 1, 1], [], []>} : vector<8x128xbf16>, vector<128x32xbf16>, vector<8x32xf32> -> vector<8x32xf32>
    %c0_15 = arith.constant 0 : index
    %c0_16 = arith.constant 0 : index
    %20 = vector.load %arg7[%c0_15, %c0_16] : memref<1x32xf32, #tpu.memory_space<vmem>>, vector<1x32xf32>
    %21 = vector.broadcast %20 : vector<1x32xf32> to vector<8x32xf32>
    %22 = arith.addf %19, %21 : vector<8x32xf32>
    %c0_17 = arith.constant 0 : index
    %c0_18 = arith.constant 0 : index
    %23 = vector.load %arg8[%c0_17, %c0_18] : memref<8x32xf32, #tpu.memory_space<vmem>>, vector<8x32xf32>
    tpu.vector_store %arg8[%c0_17, %c0_18], %22 {strides = array<i32>} : memref<8x32xf32, #tpu.memory_space<vmem>>, vector<8x32xf32>,
    return
  }
  func.func @transform_0(%arg0: i32) -> (i32, i32) {
    %c0_i32 = arith.constant 0 : i32
    %c0_i32_0 = arith.constant 0 : i32
    return %arg0, %c0_i32 : i32, i32
  }
  func.func @transform_1(%arg0: i32) -> (i32, i32) {
    %c0_i32 = arith.constant 0 : i32
    %c0_i32_0 = arith.constant 0 : i32
    %c0_i32_1 = arith.constant 0 : i32
    return %c0_i32, %c0_i32_0 : i32, i32
  }
  func.func @transform_2(%arg0: i32) -> (i32, i32) {
    %c0_i32 = arith.constant 0 : i32
    %c0_i32_0 = arith.constant 0 : i32
    %c0_i32_1 = arith.constant 0 : i32
    return %c0_i32, %c0_i32_0 : i32, i32
  }
  func.func @transform_3(%arg0: i32) -> (i32, i32) {
    %c0_i32 = arith.constant 0 : i32
    %c0_i32_0 = arith.constant 0 : i32
    %c0_i32_1 = arith.constant 0 : i32
    return %c0_i32, %c0_i32_0 : i32, i32
  }
  func.func @transform_4(%arg0: i32) -> (i32, i32) {
    %c0_i32 = arith.constant 0 : i32
    %c0_i32_0 = arith.constant 0 : i32
    %c0_i32_1 = arith.constant 0 : i32
    return %c0_i32, %c0_i32_0 : i32, i32
  }
  func.func @transform_5(%arg0: i32) -> (i32, i32) {
    %c0_i32 = arith.constant 0 : i32
    %c0_i32_0 = arith.constant 0 : i32
    %c0_i32_1 = arith.constant 0 : i32
    return %c0_i32, %c0_i32_0 : i32, i32
  }
  func.func @transform_6(%arg0: i32) -> (i32, i32) {
    %c0_i32 = arith.constant 0 : i32
    %c0_i32_0 = arith.constant 0 : i32
    %c0_i32_1 = arith.constant 0 : i32
    return %c0_i32, %c0_i32_0 : i32, i32
  }
  func.func @transform_7(%arg0: i32) -> (i32, i32) {
    %c0_i32 = arith.constant 0 : i32
    %c0_i32_0 = arith.constant 0 : i32
    return %arg0, %c0_i32 : i32, i32
  }
}

</mosaic_0001>

<bundles_post_ra>
// kernel: tpu_custom_call.1
= control target key start
LH: loop header
LB: loop body
LE: loop exit
PB: predicated region body
PF: predicated region fallthrough
CT: control target
= control target key end

     0   :  { %12 = vsyncpa [#allocation3], 0  ;;  %s647_s0 = inlined_call_operand.hbm [shape: f32[8,32], index: 0, kind: input, shape index: {}]   ;;  %s648_s1 = inlined_call_operand.vmem [shape: bf16[32,128], index: 1, kind: input, shape index: {}]   ;;  %s649_s2 = inlined_call_operand.vmem [shape: f32[1,128], index: 2, kind: input, shape index: {}]   ;;  %s650_s3 = inlined_call_operand.vmem [shape: bf16[128,128], index: 3, kind: input, shape index: {}]   ;;  %s651_s4 = inlined_call_operand.vmem [shape: f32[1,128], index: 4, kind: input, shape index: {}]   ;;  %s652_s5 = inlined_call_operand.vmem [shape: bf16[128,32], index: 5, kind: input, shape index: {}]   ;;  %s653_s6 = inlined_call_operand.vmem [shape: f32[1,32], index: 6, kind: input, shape index: {}]   ;;  %s654_s7 = inlined_call_operand.hbm [shape: f32[8,32], index: 7, kind: output, shape index: {}]  }
   0x1   :  { %13 = vsyncpa [#allocation4], 0  ;;  %s508_s24 = smov [#allocation2]  }
   0x2   :  { %s20_s25 = sshll.u32 %s508_s24, 4  ;;  %s21_s25 = int_to_ptr.vmem [resolvable:$true] %s20_s25 }
   0x3   :  { %s472_s26 = scalar_lea.vmem %s21_s25, 128  ;;  %p477_p1 = scmp.lt.s32.totalorder %s21_s25, %s21_s25 }
   0x4   :  { %p473_p0 = scmp.ne.s32.totalorder %s21_s25, %s472_s26  ;;  %p478_p2 = scmp.lt.s32.totalorder %s472_s26, %s472_s26 }
   0x6   :  { %p479_p3 = por %p478_p2, %p477_p1 }
   0x8   :  { %p480_p4 = pnand %p479_p3, %p473_p0 }
   0xa   :  { %483 = shalt.err (!%p480_p4)
}
   0xb   :  { %23 = dma.hbm_to_vmem [thread:$0]  %s647_s0, 128, %s21_s25, [#allocation3]  }
   0xc   :  { %504 = dma.done.wait [#allocation3], 128  }
   0xd   :  { %505 = vsyncadd [#allocation3], 4294967168  ;;  %v509_v0 = vmov 0.0   ;;  %vm510_vm0 = vmmov 0   ;;  %v446_v1 = vld [vmem:[%s648_s1 + $0x8] sm:$0xff]   ;;  %v447_v2 = vld [vmem:[%s648_s1] sm:$0xff]  }
   0xe   :  { %394 = vmatprep.subr.bf16.mxu0 %v509_v0  ;;  %398 = vmatprep.mubr.msk.bf16.mxu0 %vm510_vm0, %v509_v0  ;;  %v40_v3 = vld [vmem:[#allocation2] sm:$0xff]  ;;  %v448_v4 = vld [vmem:[%s650_s3 + $0x38] sm:$0xff]   ;;  %v449_v6 = vld [vmem:[%s650_s3 + $0x30] sm:$0xff]   ;;  %vm65_vm1 = vcmask 261120   ;;  %s511_s19 = smov [#allocation5]  }
   0xf   :  { %402 = vmatprep.subr.bf16.mxu1 %v509_v0  ;;  %418 = vmatprep.mubr.msk.bf16.mxu1 %vm510_vm0, %v509_v0  ;;  %v41_v5 = vpack.c.bf16 %v40_v3, %v40_v3  ;;  %v450_v7 = vld [vmem:[%s650_s3 + $0x28] sm:$0xff]   ;;  %v451_v8 = vld [vmem:[%s650_s3 + $0x20] sm:$0xff]   ;;  %v452_v9 = vld [vmem:[%s650_s3 + $0x18] sm:$0xff]   ;;  %s342_s20 = sshll.u32 %s511_s19, 4  ;;  %s343_s20 = int_to_ptr.vmem [resolvable:$true] %s342_s20 }
  0x10   :  { %395 = vmatpush3.bf16.msra.mxu0 %v446_v1  ;;  %403 = vmatpush3.bf16.msra.mxu1 %v448_v4  ;;  %v453_v10 = vld [vmem:[%s650_s3 + $0x10] sm:$0xff]   ;;  %v454_v11 = vld [vmem:[%s650_s3 + $0x8] sm:$0xff]   ;;  %v455_v12 = vld [vmem:[%s650_s3] sm:$0xff]   ;;  %p489_p6 = scmp.lt.s32.totalorder %s343_s20, %s343_s20 }
  0x11   :  { %396 = vmatprep.subr.bf16.mxu0 %v509_v0  ;;  %404 = vmatprep.subr.bf16.mxu1 %v509_v0  ;;  %v456_v13 = vld [vmem:[%s652_s5 + $0x38] sm:$0xff]   ;;  %v457_v14 = vld [vmem:[%s652_s5 + $0x30] sm:$0xff]   ;;  %v458_v15 = vld [vmem:[%s652_s5 + $0x28] sm:$0xff]  }
  0x12   :  { %v459_v16 = vld [vmem:[%s652_s5 + $0x20] sm:$0xff]   ;;  %v460_v17 = vld [vmem:[%s652_s5 + $0x18] sm:$0xff]   ;;  %v461_v18 = vld [vmem:[%s652_s5 + $0x10] sm:$0xff]  }
  0x13   :  { %v351_v19 = vld [vmem:[%s649_s2] ss:$0 sm:$0xff]  ;;  %v462_v27 = vld [vmem:[%s652_s5 + $0x8] sm:$0xff]  }
  0x14   :  { %397 = vmatpush3.bf16.msra.mxu0 %v447_v2  ;;  %405 = vmatpush3.bf16.msra.mxu1 %v449_v6  ;;  %v463_v28 = vld [vmem:[%s652_s5] sm:$0xff]  }
  0x15   :  { %422 = vmatprep.subr.bf16.mxu0 %v509_v0  ;;  %406 = vmatprep.subr.bf16.mxu1 %v509_v0  ;;  %v355_v29 = vld [vmem:[%s651_s4] ss:$0 sm:$0xff]  ;;  %s484_s4 = scalar_lea.vmem %s343_s20, 128 }
  0x16   :  { %v364_v37 = vld [vmem:[%s653_s6] ss:$0 sm:$0xff]  ;;  %p485_p5 = scmp.ne.s32.totalorder %s343_s20, %s484_s4  ;;  %p490_p7 = scmp.lt.s32.totalorder %s484_s4, %s484_s4 }
  0x17   :  { %399 = vmatmul.mubr.msk.bf16.vlgmr.msra.gmra.mxu0 %vm65_vm1, %v41_v5 }
  0x18   :  { %438 = vmatprep.mubr.msk.bf16.mxu0 %vm510_vm0, %v509_v0  ;;  %407 = vmatpush3.bf16.msra.mxu1 %v450_v7  ;;  %p491_p8 = por %p490_p7, %p489_p6 }
  0x19   :  { %408 = vmatprep.subr.bf16.mxu1 %v509_v0  ;;  %423 = vmatpush3.bf16.msra.mxu0 %v456_v13 }
  0x1a   :  { %424 = vmatprep.subr.bf16.mxu0 %v509_v0  ;;  %p492_p9 = pnand %p491_p8, %p485_p5 }
  0x1c   :  { %409 = vmatpush3.bf16.msra.mxu1 %v451_v8 }
  0x1d   :  { %410 = vmatprep.subr.bf16.mxu1 %v509_v0  ;;  %425 = vmatpush3.bf16.msra.mxu0 %v457_v14 }
  0x1e   :  { %426 = vmatprep.subr.bf16.mxu0 %v509_v0 }
  0x20   :  { %411 = vmatpush3.bf16.msra.mxu1 %v452_v9 }
  0x21   :  { %412 = vmatprep.subr.bf16.mxu1 %v509_v0  ;;  %427 = vmatpush3.bf16.msra.mxu0 %v458_v15 }
  0x22   :  { %428 = vmatprep.subr.bf16.mxu0 %v509_v0 }
  0x24   :  { %413 = vmatpush3.bf16.msra.mxu1 %v453_v10 }
  0x25   :  { %414 = vmatprep.subr.bf16.mxu1 %v509_v0  ;;  %429 = vmatpush3.bf16.msra.mxu0 %v459_v16 }
  0x26   :  { %430 = vmatprep.subr.bf16.mxu0 %v509_v0 }
  0x28   :  { %415 = vmatpush3.bf16.msra.mxu1 %v454_v11 }
  0x29   :  { %416 = vmatprep.subr.bf16.mxu1 %v509_v0  ;;  %431 = vmatpush3.bf16.msra.mxu0 %v460_v17 }
  0x2a   :  { %432 = vmatprep.subr.bf16.mxu0 %v509_v0 }
  0x2c   :  { %417 = vmatpush3.bf16.msra.mxu1 %v455_v12 }
  0x2d   :  { %433 = vmatpush3.bf16.msra.mxu0 %v461_v18 }
  0x2e   :  { %434 = vmatprep.subr.bf16.mxu0 %v509_v0 }
  0x31   :  { %435 = vmatpush3.bf16.msra.mxu0 %v462_v27 }
  0x32   :  { %436 = vmatprep.subr.bf16.mxu0 %v509_v0 }
  0x35   :  { %437 = vmatpush3.bf16.msra.mxu0 %v463_v28 }
  0xd7   :  { %v103_v20 = vpop.f32.mrf.mxu0 }
  0xd8   :  { %v104_v21 = vadd.f32 %v351_v19, %v103_v20 }
  0xd9   :  { %v400_v22 = vpop.f32.mrf.mxu0 }
  0xda   :  { %v109_v23 = vmax.f32 %v104_v21, 0.0 }
  0xdb   :  { %v106_v24 = vpop.f32.mrf.mxu0 }
  0xdc   :  { %v110_v25 = vpack.c.bf16 %v109_v23, %v109_v23 }
  0xdd   :  { %v401_v26 = vpop.f32.mrf.mxu0 }
  0xde   :  { %419 = vmatmul.mubr.bf16.vlgmr.msra.gmra.mxu1 %v110_v25 }
 0x19e   :  { %v216_v30 = vpop.f32.mrf.mxu1 }
 0x19f   :  { %v217_v31 = vadd.f32 %v355_v29, %v216_v30 }
 0x1a0   :  { %v420_v32 = vpop.f32.mrf.mxu1 }
 0x1a1   :  { %v222_v33 = vmax.f32 %v217_v31, 0.0 }
 0x1a2   :  { %v219_v34 = vpop.f32.mrf.mxu1 }
 0x1a3   :  { %v223_v35 = vpack.c.bf16 %v222_v33, %v222_v33 }
 0x1a4   :  { %v421_v36 = vpop.f32.mrf.mxu1 }
 0x1a5   :  { %439 = vmatmul.mubr.bf16.vlgmr.msra.gmra.mxu0 %v223_v35 }
 0x265   :  { %v329_v38 = vpop.f32.mrf.mxu0 }
 0x266   :  { %v330_v39 = vadd.f32 %v364_v37, %v329_v38 }
 0x267   :  { %v440_v40 = vpop.f32.mrf.mxu0 }
 0x268   :  { %335 = vst.msk [vmem:[#allocation5] sm:$0xff] %vm65_vm1, %v330_v39 }
 0x269   :  { %v332_v41 = vpop.f32.mrf.mxu0 }
 0x26a   :  { %495 = shalt.err (!%p492_p9)
}
 0x26b   :  { %345 = dma.vmem_to_hbm [thread:$0]  %s343_s20, 128, %s654_s7, [#allocation4]   ;;  %v441_v42 = vpop.f32.mrf.mxu0 }
 0x26c   :  { %506 = dma.done.wait [#allocation4], 128  }
 0x26d   :  { %507 = vsyncadd [#allocation4], 4294967168 }
 0x26e   :  { %349 = vsyncpa [#allocation3], 1 }
 0x26f   :  { %350 = vsyncpa [#allocation4], 1 }

</bundles_post_ra>
